<compile_context>
chip_gen: v7x
topology: tpu7x:2x2x1
jax: 0.10.0
libtpu: 0.0.40
codegen_flags: <defaults>
</compile_context>

<pallas_src>
import jax
import jax.numpy as jnp
from jax.experimental import pallas as pl
from jax.experimental.pallas import tpu as pltpu

OUT_DIM = 3      # classes produced by the head
OUT_PAD = 128    # lane-dense padded output width


def _glm_head_kernel(emb_ref, mask_ref,
                     w1_ref, b1_ref, w2_ref, b2_ref, w3_ref, b3_ref,
                     out_ref, acc_ref, den_ref):
    # emb_ref : (1, S_tile, E)   streamed embeddings tile (f32 or bf16)
    # mask_ref: (1, 1, S_tile)   attention-mask tile (same dtype as embeddings)
    # out_ref : (1, 1, OUT_PAD)  lane-padded logits for this batch row
    # acc_ref : (1, E) f32       running mask-weighted sum   (VMEM scratch)
    # den_ref : (1, 1) f32       running mask count          (VMEM scratch)
    k = pl.program_id(1)

    @pl.when(k == 0)
    def _init():
        acc_ref[...] = jnp.zeros_like(acc_ref)
        den_ref[...] = jnp.zeros_like(den_ref)

    emb = emb_ref[0]          # (S_tile, E)
    mask = mask_ref[0]        # (1, S_tile)

    # Mask-weighted sequence sum on the MXU, f32 accumulation.
    acc_ref[...] += jnp.dot(mask, emb, preferred_element_type=jnp.float32)
    # Mask count accumulated in f32 (exact even for long sequences / bf16 mask).
    den_ref[...] += jnp.sum(mask.astype(jnp.float32), axis=-1, keepdims=True)

    @pl.when(k == pl.num_programs(1) - 1)
    def _finalize():
        # Guard fully-masked rows (PyTorch reference would NaN here).
        denom = jnp.maximum(den_ref[...], 1e-9)
        pooled = acc_ref[...] * pl.reciprocal(denom)          # (1, E), exact 1/x

        h1 = jnp.maximum(
            jnp.dot(pooled, w1_ref[...], preferred_element_type=jnp.float32)
            + b1_ref[...], 0.0)
        h2 = jnp.maximum(
            jnp.dot(h1, w2_ref[...], preferred_element_type=jnp.float32)
            + b2_ref[...], 0.0)
        logits = jnp.dot(h2, w3_ref[...],
                         preferred_element_type=jnp.float32) + b3_ref[...]
        out_ref[0] = logits.astype(out_ref.dtype)             # (1, OUT_PAD)


def _choose_s_tile(S, E, itemsize, tile_budget_bytes):
    """Largest sequence tile (multiple of 128, dividing S) within budget."""
    if S * E * itemsize <= tile_budget_bytes:
        return S
    for cand in (2048, 1024, 512, 256, 128):
        if S % cand == 0 and cand * E * itemsize <= tile_budget_bytes:
            return cand
    return S   # fallback: whole sequence in one block


def glm_head_forward(embeddings, attention_mask, params,
                     *, tile_budget_bytes=8 << 20):
    """embeddings: (B, S, E), attention_mask: (B, S) -> logits (B, 3) f32.

    embeddings may be f32 or bf16; bf16 halves the dominant HBM stream.
    """
    B, S, E = embeddings.shape
    H = E // 2
    w1, b1, w2, b2, w3, b3 = params

    # Lane-pad the 3-wide head so the output store is a full-lane vst.
    w3p = jnp.zeros((H, OUT_PAD), jnp.float32).at[:, :OUT_DIM].set(w3)
    b3p = jnp.zeros((1, OUT_PAD), jnp.float32).at[:, :OUT_DIM].set(
        b3.reshape(1, OUT_DIM))

    # Mask shaped (B, 1, S) so every block's last-two dims are (1, S_tile)
    # with the leading "1" equal to the full middle dim.
    mask3 = attention_mask.reshape(B, 1, S).astype(embeddings.dtype)

    itemsize = embeddings.dtype.itemsize
    S_tile = _choose_s_tile(S, E, itemsize, tile_budget_bytes)
    grid = (B, S // S_tile)

    # VMEM budget from actual tile / weight bytes (x2 for double buffering)
    # plus headroom — no hard-coded 64 MiB cap.
    emb_tile_bytes = S_tile * E * itemsize
    mask_tile_bytes = S_tile * itemsize
    weight_bytes = 4 * (E * E + E + E * H + H + H * OUT_PAD + OUT_PAD)
    vmem_limit = int(2 * (emb_tile_bytes + mask_tile_bytes + OUT_PAD * 4)
                     + 2 * weight_bytes + 4 * (E + 1) + (4 << 20))
    vmem_limit = max(vmem_limit, 16 << 20)

    def const(shape):
        # Constant block index across the whole grid -> weight stays resident.
        return pl.BlockSpec(shape, lambda b, k: (0,) * len(shape))

    out3 = pl.pallas_call(
        _glm_head_kernel,
        out_shape=jax.ShapeDtypeStruct((B, 1, OUT_PAD), jnp.float32),
        grid=grid,
        in_specs=[
            pl.BlockSpec((1, S_tile, E), lambda b, k: (b, k, 0)),   # embeddings
            pl.BlockSpec((1, 1, S_tile), lambda b, k: (b, 0, k)),   # mask
            const((E, E)), const((1, E)),          # W1, b1
            const((E, H)), const((1, H)),          # W2, b2
            const((H, OUT_PAD)), const((1, OUT_PAD)),  # W3, b3 (lane-padded)
        ],
        out_specs=pl.BlockSpec((1, 1, OUT_PAD), lambda b, k: (b, 0, 0)),
        scratch_shapes=[pltpu.VMEM((1, E), jnp.float32),
                        pltpu.VMEM((1, 1), jnp.float32)],
        compiler_params=pltpu.CompilerParams(
            dimension_semantics=("parallel", "arbitrary"),
            vmem_limit_bytes=vmem_limit),
    )(embeddings, mask3, w1, b1, w2, b2, w3p, b3p)

    return out3[:, 0, :OUT_DIM]


def init_params(key, E):
    """Deterministic init of the MLP head (nn.Linear shapes, stored (in, out))."""
    H = E // 2
    k1, k2, k3 = jax.random.split(key, 3)
    w1 = jax.random.normal(k1, (E, E), jnp.float32) * (1.0 / jnp.sqrt(E))
    b1 = jnp.zeros((1, E), jnp.float32)
    w2 = jax.random.normal(k2, (E, H), jnp.float32) * (1.0 / jnp.sqrt(E))
    b2 = jnp.zeros((1, H), jnp.float32)
    w3 = jax.random.normal(k3, (H, OUT_DIM), jnp.float32) * (1.0 / jnp.sqrt(H))
    b3 = jnp.zeros((1, OUT_DIM), jnp.float32)
    return (w1, b1, w2, b2, w3, b3)


def reference_forward(embeddings, attention_mask, params):
    w1, b1, w2, b2, w3, b3 = params
    m = attention_mask[:, :, None].astype(jnp.float32)
    e = embeddings.astype(jnp.float32)
    pooled = (e * m).sum(axis=1) / m.sum(axis=1)
    h1 = jnp.maximum(pooled @ w1 + b1, 0.0)
    h2 = jnp.maximum(h1 @ w2 + b2, 0.0)
    return h2 @ w3 + b3


if __name__ == "__main__":
    B, S, E = 2, 8, 32   # small shapes: batch=2, seq=8, hidden=32

    key = jax.random.PRNGKey(0)
    k_emb, k_params = jax.random.split(key)

    # Stand-in for the frozen gLM2 last_hidden_state (see TODO above).
    embeddings = jax.random.normal(k_emb, (B, S, E), jnp.float32)
    # Attention mask with some padding at the tail of each sequence.
    attention_mask = jnp.array(
        [[1, 1, 1, 1, 1, 1, 0, 0],
         [1, 1, 1, 1, 0, 0, 0, 0]], dtype=jnp.float32)

    params = init_params(k_params, E)

    # f32 path: exact check against the pure-JAX reference.
    out = glm_head_forward(embeddings, attention_mask, params)
    out = jax.block_until_ready(out)
    ref = reference_forward(embeddings, attention_mask, params)
    assert out.shape == (B, OUT_DIM)
    assert jnp.allclose(out, ref, atol=1e-5, rtol=1e-5)

    # bf16 streaming path (production setting: halves the HBM read of (B,S,E)).
    emb_bf16 = embeddings.astype(jnp.bfloat16)
    out_bf16 = glm_head_forward(emb_bf16, attention_mask, params)
    out_bf16 = jax.block_until_ready(out_bf16)
    ref_bf16 = reference_forward(emb_bf16, attention_mask, params)
    assert out_bf16.shape == (B, OUT_DIM)
    assert jnp.allclose(out_bf16, ref_bf16, atol=2e-2, rtol=2e-2)

    print("KERNEL_OK")
</pallas_src>

<mosaic_0001>
module attributes {stable_mosaic.version = 11 : i64} {
  func.func @_glm_head_kernel(%arg0: i32, %arg1: i32, %arg2: memref<1x8x32xf32, #tpu.memory_space<vmem>>, %arg3: memref<1x1x8xf32, #tpu.memory_space<vmem>>, %arg4: memref<32x32xf32, #tpu.memory_space<vmem>>, %arg5: memref<1x32xf32, #tpu.memory_space<vmem>>, %arg6: memref<32x16xf32, #tpu.memory_space<vmem>>, %arg7: memref<1x16xf32, #tpu.memory_space<vmem>>, %arg8: memref<16x128xf32, #tpu.memory_space<vmem>>, %arg9: memref<1x128xf32, #tpu.memory_space<vmem>>, %arg10: memref<1x1x128xf32, #tpu.memory_space<vmem>>, %arg11: memref<1x32xf32, #tpu.memory_space<vmem>>, %arg12: memref<1x1xf32, #tpu.memory_space<vmem>>) attributes {dimension_semantics = [#tpu.dimension_semantics<parallel>, #tpu.dimension_semantics<arbitrary>], iteration_bounds = array<i64: 2, 1>, scalar_prefetch = 0 : i64, scratch_operands = 2 : i64, tpu.core_type = #tpu.core_type<tc>, window_params = [{transform_indices = @transform_0, window_bounds = array<i64: 1, 8, 32>}, {transform_indices = @transform_1, window_bounds = array<i64: 1, 1, 8>}, {pipeline_mode = #tpu.pipeline_mode<synchronous>, transform_indices = @transform_2, window_bounds = array<i64: 32, 32>}, {pipeline_mode = #tpu.pipeline_mode<synchronous>, transform_indices = @transform_3, window_bounds = array<i64: 1, 32>}, {pipeline_mode = #tpu.pipeline_mode<synchronous>, transform_indices = @transform_4, window_bounds = array<i64: 32, 16>}, {pipeline_mode = #tpu.pipeline_mode<synchronous>, transform_indices = @transform_5, window_bounds = array<i64: 1, 16>}, {pipeline_mode = #tpu.pipeline_mode<synchronous>, transform_indices = @transform_6, window_bounds = array<i64: 16, 128>}, {pipeline_mode = #tpu.pipeline_mode<synchronous>, transform_indices = @transform_7, window_bounds = array<i64: 1, 128>}, {transform_indices = @transform_8, window_bounds = array<i64: 1, 1, 128>}]} {
    %c0_i32 = arith.constant 0 : i32
    %0 = arith.cmpi eq, %arg1, %c0_i32 : i32
    %1 = arith.extui %0 : i1 to i32
    %c0_i32_0 = arith.constant 0 : i32
    %2 = arith.cmpi ne, %1, %c0_i32_0 : i32
    scf.if %2 {
      %cst_17 = arith.constant 0.000000e+00 : f32
      %19 = vector.broadcast %cst_17 : f32 to vector<1x32xf32>
      %c0_18 = arith.constant 0 : index
      %c0_19 = arith.constant 0 : index
      %20 = vector.load %arg11[%c0_18, %c0_19] : memref<1x32xf32, #tpu.memory_space<vmem>>, vector<1x32xf32>
      tpu.vector_store %arg11[%c0_18, %c0_19], %19 {strides = array<i32>} : memref<1x32xf32, #tpu.memory_space<vmem>>, vector<1x32xf32>,
      %cst_20 = arith.constant 0.000000e+00 : f32
      %21 = vector.broadcast %cst_20 : f32 to vector<1x1xf32>
      %c0_21 = arith.constant 0 : index
      %c0_22 = arith.constant 0 : index
      %22 = vector.load %arg12[%c0_21, %c0_22] : memref<1x1xf32, #tpu.memory_space<vmem>>, vector<1x1xf32>
      tpu.vector_store %arg12[%c0_21, %c0_22], %21 {strides = array<i32>} : memref<1x1xf32, #tpu.memory_space<vmem>>, vector<1x1xf32>,
    } else {
    }
    %c0 = arith.constant 0 : index
    %c0_1 = arith.constant 0 : index
    %c0_2 = arith.constant 0 : index
    %3 = vector.load %arg2[%c0, %c0_1, %c0_2] : memref<1x8x32xf32, #tpu.memory_space<vmem>>, vector<1x8x32xf32>
    %4 = vector.shape_cast %3 : vector<1x8x32xf32> to vector<8x32xf32>
    %c0_3 = arith.constant 0 : index
    %c0_4 = arith.constant 0 : index
    %c0_5 = arith.constant 0 : index
    %5 = vector.load %arg3[%c0_3, %c0_4, %c0_5] : memref<1x1x8xf32, #tpu.memory_space<vmem>>, vector<1x1x8xf32>
    %6 = vector.shape_cast %5 : vector<1x1x8xf32> to vector<1x8xf32>
    %c0_6 = arith.constant 0 : index
    %c0_7 = arith.constant 0 : index
    %7 = vector.load %arg11[%c0_6, %c0_7] : memref<1x32xf32, #tpu.memory_space<vmem>>, vector<1x32xf32>
    %cst = arith.constant dense<0.000000e+00> : vector<1x32xf32>
    %8 = tpu.matmul %6, %4, %cst {dimension_numbers = #tpu.dot_dimension_numbers<[1], [0], [0], [1], [0, 0, 1, 1], [], []>} : vector<1x8xf32>, vector<8x32xf32>, vector<1x32xf32> -> vector<1x32xf32>
    %9 = arith.addf %7, %8 : vector<1x32xf32>
    %c0_8 = arith.constant 0 : index
    %c0_9 = arith.constant 0 : index
    %10 = vector.load %arg11[%c0_8, %c0_9] : memref<1x32xf32, #tpu.memory_space<vmem>>, vector<1x32xf32>
    tpu.vector_store %arg11[%c0_8, %c0_9], %9 {strides = array<i32>} : memref<1x32xf32, #tpu.memory_space<vmem>>, vector<1x32xf32>,
    %c0_10 = arith.constant 0 : index
    %c0_11 = arith.constant 0 : index
    %11 = vector.load %arg12[%c0_10, %c0_11] : memref<1x1xf32, #tpu.memory_space<vmem>>, vector<1x1xf32>
    %cst_12 = arith.constant dense<0.000000e+00> : vector<1xf32>
    %12 = vector.multi_reduction <add>, %6, %cst_12 [1] : vector<1x8xf32> to vector<1xf32>
    %13 = vector.shape_cast %12 : vector<1xf32> to vector<1x1xf32>
    %14 = arith.addf %11, %13 : vector<1x1xf32>
    %c0_13 = arith.constant 0 : index
    %c0_14 = arith.constant 0 : index
    %15 = vector.load %arg12[%c0_13, %c0_14] : memref<1x1xf32, #tpu.memory_space<vmem>>, vector<1x1xf32>
    tpu.vector_store %arg12[%c0_13, %c0_14], %14 {strides = array<i32>} : memref<1x1xf32, #tpu.memory_space<vmem>>, vector<1x1xf32>,
    %c0_i32_15 = arith.constant 0 : i32
    %16 = arith.cmpi eq, %arg1, %c0_i32_15 : i32
    %17 = arith.extui %16 : i1 to i32
    %c0_i32_16 = arith.constant 0 : i32
    %18 = arith.cmpi ne, %17, %c0_i32_16 : i32
    scf.if %18 {
      %c0_17 = arith.constant 0 : index
      %c0_18 = arith.constant 0 : index
      %19 = vector.load %arg12[%c0_17, %c0_18] : memref<1x1xf32, #tpu.memory_space<vmem>>, vector<1x1xf32>
      %cst_19 = arith.constant 9.99999971E-10 : f32
      %20 = vector.broadcast %cst_19 : f32 to vector<1x1xf32>
      %21 = arith.maximumf %19, %20 : vector<1x1xf32>
      %c0_20 = arith.constant 0 : index
      %c0_21 = arith.constant 0 : index
      %22 = vector.load %arg11[%c0_20, %c0_21] : memref<1x32xf32, #tpu.memory_space<vmem>>, vector<1x32xf32>
      %23 = tpu.reciprocal %21 : vector<1x1xf32> -> vector<1x1xf32>
      %24 = vector.broadcast %23 : vector<1x1xf32> to vector<1x32xf32>
      %25 = arith.mulf %22, %24 : vector<1x32xf32>
      %c0_22 = arith.constant 0 : index
      %c0_23 = arith.constant 0 : index
      %26 = vector.load %arg4[%c0_22, %c0_23] : memref<32x32xf32, #tpu.memory_space<vmem>>, vector<32x32xf32>
      %cst_24 = arith.constant dense<0.000000e+00> : vector<1x32xf32>
      %27 = tpu.matmul %25, %26, %cst_24 {dimension_numbers = #tpu.dot_dimension_numbers<[1], [0], [0], [1], [0, 0, 1, 1], [], []>} : vector<1x32xf32>, vector<32x32xf32>, vector<1x32xf32> -> vector<1x32xf32>
      %c0_25 = arith.constant 0 : index
      %c0_26 = arith.constant 0 : index
      %28 = vector.load %arg5[%c0_25, %c0_26] : memref<1x32xf32, #tpu.memory_space<vmem>>, vector<1x32xf32>
      %29 = arith.addf %27, %28 : vector<1x32xf32>
      %cst_27 = arith.constant 0.000000e+00 : f32
      %30 = vector.broadcast %cst_27 : f32 to vector<1x32xf32>
      %31 = arith.maximumf %29, %30 : vector<1x32xf32>
      %c0_28 = arith.constant 0 : index
      %c0_29 = arith.constant 0 : index
      %32 = vector.load %arg6[%c0_28, %c0_29] : memref<32x16xf32, #tpu.memory_space<vmem>>, vector<32x16xf32>
      %cst_30 = arith.constant dense<0.000000e+00> : vector<1x16xf32>
      %33 = tpu.matmul %31, %32, %cst_30 {dimension_numbers = #tpu.dot_dimension_numbers<[1], [0], [0], [1], [0, 0, 1, 1], [], []>} : vector<1x32xf32>, vector<32x16xf32>, vector<1x16xf32> -> vector<1x16xf32>
      %c0_31 = arith.constant 0 : index
      %c0_32 = arith.constant 0 : index
      %34 = vector.load %arg7[%c0_31, %c0_32] : memref<1x16xf32, #tpu.memory_space<vmem>>, vector<1x16xf32>
      %35 = arith.addf %33, %34 : vector<1x16xf32>
      %cst_33 = arith.constant 0.000000e+00 : f32
      %36 = vector.broadcast %cst_33 : f32 to vector<1x16xf32>
      %37 = arith.maximumf %35, %36 : vector<1x16xf32>
      %c0_34 = arith.constant 0 : index
      %c0_35 = arith.constant 0 : index
      %38 = vector.load %arg8[%c0_34, %c0_35] : memref<16x128xf32, #tpu.memory_space<vmem>>, vector<16x128xf32>
      %cst_36 = arith.constant dense<0.000000e+00> : vector<1x128xf32>
      %39 = tpu.matmul %37, %38, %cst_36 {dimension_numbers = #tpu.dot_dimension_numbers<[1], [0], [0], [1], [0, 0, 1, 1], [], []>} : vector<1x16xf32>, vector<16x128xf32>, vector<1x128xf32> -> vector<1x128xf32>
      %c0_37 = arith.constant 0 : index
      %c0_38 = arith.constant 0 : index
      %40 = vector.load %arg9[%c0_37, %c0_38] : memref<1x128xf32, #tpu.memory_space<vmem>>, vector<1x128xf32>
      %41 = arith.addf %39, %40 : vector<1x128xf32>
      %c0_39 = arith.constant 0 : index
      %c0_40 = arith.constant 0 : index
      %c0_41 = arith.constant 0 : index
      %42 = vector.load %arg10[%c0_39, %c0_40, %c0_41] : memref<1x1x128xf32, #tpu.memory_space<vmem>>, vector<1x1x128xf32>
      %43 = vector.shape_cast %42 : vector<1x1x128xf32> to vector<1x128xf32>
      %44 = vector.shape_cast %41 : vector<1x128xf32> to vector<1x1x128xf32>
      tpu.vector_store %arg10[%c0_39, %c0_40, %c0_41], %44 {strides = array<i32>} : memref<1x1x128xf32, #tpu.memory_space<vmem>>, vector<1x1x128xf32>,
    } else {
    }
    return
  }
  func.func @transform_0(%arg0: i32, %arg1: i32) -> (i32, i32, i32) {
    %c0_i32 = arith.constant 0 : i32
    %c0_i32_0 = arith.constant 0 : i32
    return %arg0, %arg1, %c0_i32 : i32, i32, i32
  }
  func.func @transform_1(%arg0: i32, %arg1: i32) -> (i32, i32, i32) {
    %c0_i32 = arith.constant 0 : i32
    %c0_i32_0 = arith.constant 0 : i32
    return %arg0, %c0_i32, %arg1 : i32, i32, i32
  }
  func.func @transform_2(%arg0: i32, %arg1: i32) -> (i32, i32) {
    %c0_i32 = arith.constant 0 : i32
    %c0_i32_0 = arith.constant 0 : i32
    %c0_i32_1 = arith.constant 0 : i32
    return %c0_i32, %c0_i32_0 : i32, i32
  }
  func.func @transform_3(%arg0: i32, %arg1: i32) -> (i32, i32) {
    %c0_i32 = arith.constant 0 : i32
    %c0_i32_0 = arith.constant 0 : i32
    %c0_i32_1 = arith.constant 0 : i32
    return %c0_i32, %c0_i32_0 : i32, i32
  }
  func.func @transform_4(%arg0: i32, %arg1: i32) -> (i32, i32) {
    %c0_i32 = arith.constant 0 : i32
    %c0_i32_0 = arith.constant 0 : i32
    %c0_i32_1 = arith.constant 0 : i32
    return %c0_i32, %c0_i32_0 : i32, i32
  }
  func.func @transform_5(%arg0: i32, %arg1: i32) -> (i32, i32) {
    %c0_i32 = arith.constant 0 : i32
    %c0_i32_0 = arith.constant 0 : i32
    %c0_i32_1 = arith.constant 0 : i32
    return %c0_i32, %c0_i32_0 : i32, i32
  }
  func.func @transform_6(%arg0: i32, %arg1: i32) -> (i32, i32) {
    %c0_i32 = arith.constant 0 : i32
    %c0_i32_0 = arith.constant 0 : i32
    %c0_i32_1 = arith.constant 0 : i32
    return %c0_i32, %c0_i32_0 : i32, i32
  }
  func.func @transform_7(%arg0: i32, %arg1: i32) -> (i32, i32) {
    %c0_i32 = arith.constant 0 : i32
    %c0_i32_0 = arith.constant 0 : i32
    %c0_i32_1 = arith.constant 0 : i32
    return %c0_i32, %c0_i32_0 : i32, i32
  }
  func.func @transform_8(%arg0: i32, %arg1: i32) -> (i32, i32, i32) {
    %c0_i32 = arith.constant 0 : i32
    %c0_i32_0 = arith.constant 0 : i32
    %c0_i32_1 = arith.constant 0 : i32
    return %arg0, %c0_i32, %c0_i32_0 : i32, i32, i32
  }
}

</mosaic_0001>

<bundles_post_ra>
// kernel: tpu_custom_call.1
= control target key start
LH: loop header
LB: loop body
LE: loop exit
PB: predicated region body
PF: predicated region fallthrough
CT: control target
= control target key end

     0   :  { %13 = vsyncpa [#allocation5], 0  ;;  %s1436_s0 = inlined_call_operand.vmem [shape: f32[2,8,32], index: 0, kind: input, shape index: {}]   ;;  %s1437_s1 = inlined_call_operand.vmem [shape: f32[2,1,8], index: 1, kind: input, shape index: {}]   ;;  %s1438_s2 = inlined_call_operand.vmem [shape: f32[32,32], index: 2, kind: input, shape index: {}]   ;;  %s1439_s3 = inlined_call_operand.hbm [shape: f32[1,32], index: 3, kind: input, shape index: {}]   ;;  %s1440_s4 = inlined_call_operand.vmem [shape: f32[32,16], index: 4, kind: input, shape index: {}]   ;;  %s1441_s5 = inlined_call_operand.hbm [shape: f32[1,16], index: 5, kind: input, shape index: {}]   ;;  %s1442_s6 = inlined_call_operand.vmem [shape: f32[16,128], index: 6, kind: input, shape index: {}]   ;;  %s1443_s7 = inlined_call_operand.vmem [shape: f32[1,128], index: 7, kind: input, shape index: {}]   ;;  %s1444_s8 = inlined_call_operand.hbm [shape: f32[2,1,128], index: 8, kind: output, shape index: {}]  }
   0x1   :  { %14 = vsyncpa [#allocation8], 0 }
   0x2   :  { %15 = vsyncpa [#allocation6], 0 }
   0x3   :  { %17 = vsyncpa [#allocation6 + $0x1], 0  ;;  %s1197_s27 = smov 0   ;;  %s1199_s28 = smov 0  }
   0x4   :  { %s1201_s29 = smov 0   ;;  %s1203_s30 = smov 0  }
   0x5   :  { %s1205_s9 = smov 0   ;;  %s1207_s10 = smov 0  }
   0x6 LB: > { %1451 = sst [smem:[#allocation13_spill]] %s1139_s9  ;;  %s837_s11 = sadd.s32 4294967295, %s1143_s10   ;;  %s1143_s10 = sphi %s1207_s10, %s23_s10   ;;  %s1139_s9 = sphi %s1205_s9, %s1463_s9   ;;  %s1135_s30 = sphi %s1203_s30, %s1462_s30   ;;  %s1131_s29 = sphi %s1201_s29, %s1466_s29   ;;  %s1127_s28 = sphi %s1199_s28, %s1465_s28   ;;  %s1123_s27 = sphi %s1197_s27, %s1464_s27  }
   0x7   : > { %s838_s12 = sadd.s32 4294967294, %s1143_s10   ;;  %s35_s13 = sadd.s32 1, %s1139_s9 }
   0x8   : > { %s224_s14 = sadd.s32 1, %s1131_s29  ;;  %p37_p0 = scmp.ge.s32.totalorder %s35_s13, 2 }
   0x9   : > { %p234_p1 = scmp.ne.s32.totalorder %s1131_s29, %s1127_s28  ;;  %p235_p2 = scmp.eq.s32.totalorder %s837_s11, 1 }
   0xa   : > { %p240_p3 = scmp.ne.s32.totalorder %s1127_s28, %s1123_s27  ;;  %s1468_s13 = smov (%p37_p0, %s35_s13), 0 }
   0xb   : > { %1452 = sst [smem:[#allocation14_spill]] %s1468_s13  ;;  %p1237_p4 = por %p235_p2, %p234_p1 }
   0xc   : > { %p241_p5 = scmp.eq.s32.totalorder %s838_s12, 1  ;;  %s221_s16 = ssub.s32 %s1139_s9, %s1468_s13 }
   0xd   : > { %s1453_s15 = scalar_select %p1237_p4, 1, 0 }
   0xe   : > { %p839_p6 = scmp.ge.s32.totalorder %s1143_s10, 1  ;;  %p222_p7 = scmp.eq.s32.totalorder %s221_s16, 0 }
   0xf   : > { %p1244_p8 = por %p241_p5, %p240_p3  ;;  %p248_p9 = scmp.lt.s32.totalorder %s1143_s10, 3 }
  0x10   : > { %s1250_s18 = scalar_select %p222_p7, %s1131_s29, %s224_s14  }
  0x11   : > { %s1454_s17 = scalar_select %p1244_p8, 1, 0 }
  0x12   : > { %p1252_p10 = pnand %p839_p6, %p248_p9  ;;  %p1256_p11 = scmp.eq.s32.totalorder %s837_s11, 0 }
  0x13   : > { %s1145_s21 = smov [#allocation4]   ;;  %s1146_s23 = smov [#allocation7]  }
  0x14   : > { %s1455_s19 = scalar_select %p1252_p10, 1, 0 }
  0x15   : > { %s1456_s20 = scalar_select %p1256_p11, 1, 0 }
  0x16   : > { %p928_p12 = pneg %p1252_p10  ;;  %s264_s22 = sshll.u32 %s1145_s21, 4  ;;  %s265_s22 = int_to_ptr.vmem [resolvable:$true] %s264_s22 }
  0x17   : > { %s278_s24 = sshll.u32 %s1146_s23, 4  ;;  %s1001_s12 = scalar_lea.hbm %s1439_s3, 16  ;;  %s1268_s24 = int_to_ptr.vmem [resolvable:$true] %s278_s24 }
  0x18   : > { %p1264_p13 = pnand %p1256_p11, %p928_p12  ;;  %p1002_p0 = scmp.ne.s32.totalorder %s1439_s3, %s1001_s12 }
  0x19   : > { %p1008_p5 = scmp.lt.u32.totalorder %s1001_s12, %s1439_s3 }
  0x1a   : > { %p1003_p1 = pneg %p1264_p13 }
  0x1c   : > { %p1004_p2 = pnand %p1003_p1, %p1002_p0 }
  0x1e   : > { %p1005_p3 = pneg %p1004_p2 }
  0x20   : > { %p1010_p6 = pnand %p1008_p5, %p1005_p3 }
  0x22   : > { %1013 = shalt.err (!%p1010_p6)
}
  0x23   : > { %s1014_s13 = scalar_lea.vmem %s265_s22, 16  ;;  %s1021_s26 = scalar_lea.vmem %s265_s22, 32 }
  0x24   : > { %p1015_p7 = scmp.ne.s32.totalorder %s265_s22, %s1014_s13  ;;  %p1022_p8 = scmp.lt.s32.totalorder %s265_s22, %s265_s22 }
  0x25   : > { %p1023_p4 = scmp.lt.s32.totalorder %s1021_s26, %s1014_s13 }
  0x26   : > { %p1017_p9 = pnand %p1015_p7, %p1003_p1 }
  0x27   : > { %p1024_p11 = por %p1023_p4, %p1022_p8 }
  0x28   : > { %p1018_p12 = pneg %p1017_p9 }
  0x2a   : > { %p1025_p10 = pnand %p1024_p11, %p1018_p12 }
  0x2c   : > { %1028 = shalt.err (!%p1025_p10)
}
  0x2d   : > { %931 = dma.hbm_to_vmem [thread:$0]  (!%p1264_p13), %s1439_s3, 16, %s265_s22, [#allocation5]  }
  0x2e   : > { %s1029_s21 = scalar_lea.hbm %s1441_s5, 16 }
  0x2f   : > { %p1030_p0 = scmp.ne.s32.totalorder %s1441_s5, %s1029_s21  ;;  %p1036_p10 = scmp.lt.u32.totalorder %s1029_s21, %s1441_s5 }
  0x31   : > { %p1032_p4 = pnand %p1030_p0, %p1003_p1 }
  0x33   : > { %p1033_p8 = pneg %p1032_p4 }
  0x35   : > { %p1038_p11 = pnand %p1036_p10, %p1033_p8 }
  0x37   : > { %1041 = shalt.err (!%p1038_p11)
}
  0x38   : > { %s1042_s22 = scalar_lea.vmem %s1268_s24, 16  ;;  %s1049_s9 = scalar_lea.vmem %s1268_s24, 32 }
  0x39   : > { %p1043_p2 = scmp.ne.s32.totalorder %s1268_s24, %s1042_s22  ;;  %p1050_p6 = scmp.lt.s32.totalorder %s1268_s24, %s1268_s24 }
  0x3a   : > { %p1051_p7 = scmp.lt.s32.totalorder %s1049_s9, %s1042_s22 }
  0x3b   : > { %p1045_p3 = pnand %p1043_p2, %p1003_p1 }
  0x3c   : > { %p1052_p9 = por %p1051_p7, %p1050_p6 }
  0x3d   : > { %p1046_p5 = pneg %p1045_p3 }
  0x3f   : > { %p1053_p12 = pnand %p1052_p9, %p1046_p5 }
  0x41   : > { %1056 = shalt.err (!%p1053_p12)
}
  0x42   : > { %934 = dma.hbm_to_vmem [thread:$0]  (!%p1264_p13), %s1441_s5, 16, %s1268_s24, [#allocation8]  }
  0x43   : > { %p1458_p0 = scmp.ne.s32.totalorder %s1455_s19, 0 }
  0x44   : > { %p1459_p1 = scmp.ne.s32.totalorder (!%p1458_p0), %s1456_s20, 0 }
  0x45   : > { %316 = sbr.rel (%p1458_p0) target bundleno = 1043 (0x413), region = 52 }
  0x4c   : > { %1110 = dma.done.wait (%p1459_p1), [#allocation5], 16  }
  0x4d   : > { %1112 = vsyncadd (%p1459_p1), [#allocation5], 4294967280 }
  0x4e   : > { %1114 = dma.done.wait (%p1459_p1), [#allocation8], 16  }
  0x4f   : > { %1116 = vsyncadd (%p1459_p1), [#allocation8], 4294967280  ;;  %p361_p4 = scmp.lt.s32.totalorder %s1135_s30, 1  ;;  %v1147_v0 = vmov 0.0   ;;  %vm1148_vm0 = vmmov 0   ;;  %vm380_vm1 = vcmask 0   ;;  %v482_v25 = vlaneseq }
  0x50   : > { %869 = vmatprep.subr.mxu0 %v1147_v0  ;;  %871 = vmatprep.mubr.msk.f32.mxu0 %vm1148_vm0, %v1147_v0  ;;  %381 = vst.msk [vmem:[#allocation3] sm:$0x1] %vm380_vm1, %v1147_v0  ;;  %vm463_vm2 = vcmask 57344   ;;  %vm385_vm3 = vcmask 64512   ;;  %v1149_v4 = vmov 0   ;;  %vm378_vm4 = vcmask 253952  }
  0x51   : > { %s362_s19 = scalar_select %p361_p4, %s1135_s30, 1  ;;  %882 = vmatprep.mubr.msk.f32.mxu1 %vm1148_vm0, %v1147_v0  ;;  %998 = vset.pattern.permute.xlu0 %v1149_v4  ;;  %379 = vst.msk [vmem:[#allocation2] sm:$0x1] %vm378_vm4, %v1147_v0  ;;  %v487_v5 = vld [vmem:[%s1438_s2] sm:$0xff]  ;;  %v488_v6 = vld [vmem:[%s1438_s2 + $0x8] sm:$0xff]  ;;  %v1150_v7 = vmov 0.0|0.0  }
  0x52   : > { %903 = vmatprep.subr.bf16.mxu1 %v1150_v7  ;;  %v904_v8 = vpack.c.bf16 %v488_v6, %v487_v5  ;;  %v489_v14 = vld [vmem:[%s1438_s2 + $0x10] sm:$0xff]  ;;  %v490_v15 = vld [vmem:[%s1438_s2 + $0x18] sm:$0xff]  ;;  %v567_v18 = vld [vmem:[%s1440_s4] sm:$0xff]  ;;  %v483_v26 = vshrl.u32 %v482_v25, 7  ;;  %vm492_vm5 = vcmask 261120   ;;  %vm649_vm6 = vcmask 130048  }
  0x53   : > { %s373_s25 = scalar_lea.vmem %s1437_s1, %s362_s19  ;;  %s846_s12 = sshll.u32 %s362_s19, 3  ;;  %v907_v17 = vpack.c.bf16 %v490_v15, %v489_v14  ;;  %v568_v19 = vld [vmem:[%s1440_s4 + $0x8] sm:$0xff]  ;;  %v569_v32 = vld [vmem:[%s1440_s4 + $0x10] sm:$0xff]  ;;  %v570_v33 = vld [vmem:[%s1440_s4 + $0x18] sm:$0xff] }
  0x54   : > { %s367_s23 = scalar_lea.vmem %s1436_s0, %s846_s12  ;;  %v383_v1 = vld [vmem:[%s373_s25] sm:$0x1]  ;;  %905 = vmatpush3.bf16.msra.mxu1 %v904_v8  ;;  %v910_v20 = vpack.c.bf16 %v568_v19, %v567_v18  ;;  %v484_v27 = vsub.s32 0, %v483_v26  ;;  %v913_v34 = vpack.c.bf16 %v570_v33, %v569_v32  ;;  %v491_v35 = vld [vmem:[#allocation4] sm:$0x1]  ;;  %v647_v41 = vld [vmem:[%s1442_s6 + $0x8] sm:$0xff] }
  0x55   : > { %v382_v2 = vld [vmem:[%s367_s23] sm:$0xff]  ;;  %v464_v3 = vsel %vm463_vm2, %v383_v1, 0.0  ;;  %906 = vmatprep.subr.bf16.mxu1 %v1150_v7  ;;  %s359_s19 = sand.u32 1, %s1127_s28   ;;  %s851_s25 = sshll.u32 %s1135_s30, 4 }
  0x56   : > { %870 = vmatpush3.msra.mxu0 %v382_v2  ;;  %465 = vadd.xlane.f32.xlu0 %v464_v3  ;;  %v646_v40 = vld [vmem:[%s1442_s6] sm:$0xff]  ;;  %s360_s12 = scalar_lea.vmem [#allocation9], %s359_s19  ;;  %s1389_s13 = scalar_lea.hbm %s1444_s8, %s851_s25 }
  0x57   : > { %872 = vmatmul.mubr.msk.f32.vlgmr.msra.gmra.mrb[0].mxu0 %vm385_vm3, %v383_v1  ;;  %909 = vmatprep.subr.bf16.mxu0 %v1150_v7  ;;  %v462_v9 = vld [vmem:[#allocation3] sm:$0x1]  ;;  %v916_v42 = vpack.c.bf16 %v647_v41, %v646_v40  ;;  %v571_v43 = vld [vmem:[#allocation7] sm:$0x1]  ;;  %v648_v48 = vld [vmem:[%s1443_s7] sm:$0x1] }
  0x58   : > { %893 = vmatprep.mubr.msk.f32.mxu0 %vm1148_vm0, %v1147_v0  ;;  %908 = vmatpush3.bf16.msra.mxu1 %v907_v17  ;;  %v384_v21 = vld [vmem:[#allocation2] sm:$0x1]  ;;  %s737_s16 = sshll.u32 %s360_s12, 4  ;;  %s725_s26 = scalar_lea.sflag [#allocation6], %s359_s19  ;;  %s1391_s16 = int_to_ptr.vmem [resolvable:$true] %s737_s16 }
  0x59   : > { %915 = vmatprep.subr.bf16.mxu1 %v1150_v7  ;;  %911 = vmatpush3.bf16.msra.mxu0 %v910_v20  ;;  %s1057_s22 = scalar_lea.vmem %s1391_s16, 16  ;;  %p1460_p8 = scmp.ne.s32.totalorder %s1453_s15, 0 }
  0x5a   : > { %912 = vmatprep.subr.bf16.mxu0 %v1150_v7  ;;  %p1058_p13 = scmp.ne.s32.totalorder %s1391_s16, %s1057_s22  ;;  %s1151_s30 = smov [#allocation9]  }
  0x5b   : > { %s1061_s9 = sshll.u32 %s1151_s30, 4  ;;  %s1062_s9 = int_to_ptr.vmem [resolvable:$false] %s1061_s9 }
  0x5c   : > { %p1059_p10 = pnand %p1058_p13, %p1460_p8  ;;  %s1063_s11 = scalar_lea.vmem %s1062_s9, 32 }
  0x5d   : > { %914 = vmatpush3.bf16.msra.mxu0 %v913_v34  ;;  %p1064_p2 = scmp.lt.s32.totalorder %s1391_s16, %s1062_s9  ;;  %p1065_p3 = scmp.lt.s32.totalorder %s1063_s11, %s1057_s22 }
  0x5e   : > { %p1060_p11 = pneg %p1059_p10 }
  0x5f   : > { %p1066_p5 = por %p1065_p3, %p1064_p2 }
  0x61   : > { %p1067_p6 = pnand %p1066_p5, %p1060_p11 }
  0xe3   : > { %v466_v10 = vpop.xlane.xlu0 %465 }
  0xe4   : > { %v467_v11 = vadd.f32 %v466_v10, %v462_v9 }
  0xe6   : > { %469 = vst.msk [vmem:[#allocation3] sm:$0x1] %vm380_vm1, %v467_v11 }
  0xed   : > { %v473_v12 = vld [vmem:[#allocation3] sm:$0x1] }
  0xee   : > { %v474_v13 = vmax.f32 %v473_v12, 1e-09 }
  0xf0   : > { %999 = vrcp.f32 %v474_v13 }
  0xfa   : > { %v1000_v16 = vpop.eup %999 }
  0xfb   : > { %479 = vperm.xlu0 %998, %v1000_v16  }
 0x12a   : > { %v455_v22 = vpop.f32.mrb[0].mxu0 }
 0x12b   : > { %v459_v23 = vadd.f32 %v455_v22, %v384_v21  ;;  %v873_v24 = vpop.f32.mrb[1].mxu0 }
 0x12d   : > { %461 = vst.msk [vmem:[#allocation2] sm:$0x1] %vm378_vm4, %v459_v23 }
 0x134   : > { %v475_v29 = vld [vmem:[#allocation2] sm:$0x1] }
 0x17a   : > { %v480_v28 = vpop.permute.xlu0 %479 }
 0x17b   : > { %v485_v30 = vrot.slane %v480_v28, %v484_v27 }
 0x17d   : > { %v486_v31 = vmul.f32 %v485_v30, %v475_v29 }
 0x17f   : > { %883 = vmatmul.mubr.msk.f32.vlgmr.msra.gmra.mrb[0].mxu1 %vm492_vm5, %v486_v31 }
 0x180   : > { %900 = vmatprep.mubr.msk.f32.mxu1 %vm1148_vm0, %v1147_v0  ;;  %917 = vmatpush3.bf16.msra.mxu1 %v916_v42 }
 0x252   : > { %v562_v36 = vpop.f32.mrb[0].mxu1 }
 0x253   : > { %v563_v37 = vadd.f32 %v562_v36, %v491_v35  ;;  %v884_v38 = vpop.f32.mrb[1].mxu1 }
 0x255   : > { %v566_v39 = vmax.f32 %v563_v37, 0.0 }
 0x257   : > { %894 = vmatmul.mubr.msk.f32.vlgmr.msra.gmra.mrb[2].mxu0 %vm492_vm5, %v566_v39 }
 0x32a   : > { %v641_v44 = vpop.f32.mrb[2].mxu0 }
 0x32b   : > { %v642_v45 = vadd.f32 %v641_v44, %v571_v43  ;;  %v895_v46 = vpop.f32.mrb[3].mxu0 }
 0x32d   : > { %v645_v47 = vmax.f32 %v642_v45, 0.0 }
 0x32f   : > { %901 = vmatmul.mubr.msk.f32.vlgmr.msra.gmra.mrb[2].mxu1 %vm649_vm6, %v645_v47 }
 0x402   : > { %v719_v49 = vpop.f32.mrb[2].mxu1 }
 0x403   : > { %v720_v50 = vadd.f32 %v719_v49, %v648_v48  ;;  %v902_v51 = vpop.f32.mrb[3].mxu1 }
 0x405   : > { %723 = vst [vmem:[%s360_s12] sm:$0x1] %v720_v50 }
 0x406   : > { %1070 = shalt.err (!%p1067_p6)
}
 0x407   : > { %s1071_s14 = scalar_lea.hbm %s1389_s13, 16  ;;  %s1075_s24 = scalar_lea.hbm %s1444_s8, 32 }
 0x408   : > { %p1072_p7 = scmp.ne.s32.totalorder %s1389_s13, %s1071_s14  ;;  %p1076_p0 = scmp.lt.u32.totalorder %s1389_s13, %s1444_s8 }
 0x409   : > { %p1077_p1 = scmp.lt.u32.totalorder %s1075_s24, %s1071_s14  ;;  %p1079_p13 = scmp.lt.u32.totalorder %s1071_s14, %s1389_s13 }
 0x40a   : > { %p1073_p9 = pnand %p1072_p7, %p1460_p8 }
 0x40b   : > { %p1078_p4 = por %p1077_p1, %p1076_p0 }
 0x40c   : > { %p1074_p12 = pneg %p1073_p9 }
 0x40d   : > { %p1080_p10 = por %p1079_p13, %p1078_p4 }
 0x40f   : > { %p1081_p11 = pnand %p1080_p10, %p1074_p12 }
 0x411   : > { %1084 = shalt.err (!%p1081_p11)
}
 0x412   : > { %926 = dma.vmem_to_hbm [thread:$0]  (%p1460_p8), %s1391_s16, 16, %s1389_s13, %s725_s26  }
 0x413 PF: > { %p943_p2 = scmp.ge.s32.totalorder %s1143_s10, 2  ;;  %s749_s21 = sand.u32 1, %s1123_s27  }
 0x414   : > { %p1461_p3 = scmp.ne.s32.totalorder %s1454_s17, 0  ;;  %s750_s23 = scalar_lea.sflag [#allocation6], %s749_s21 }
 0x416   : > { %p936_p5 = pnand %p943_p2, %p1461_p3 }
 0x418   : > { %1118 = dma.done.wait (!%p936_p5), %s750_s23, 16  }
 0x419   : > { %1120 = vsyncadd (!%p936_p5), %s750_s23, 4294967280  ;;  %s23_s10 = sadd.s32 1, %s1143_s10   ;;  %s1462_s30 = sld [smem:[#allocation13_spill]] }
 0x41a   : > { %p20_p6 = scmp.ge.s32.totalorder %s23_s10, 4   ;;  %s1463_s9 = sld [smem:[#allocation14_spill]] }
 0x41b   : > { %s1464_s27 = smov %s1127_s28  ;;  %s1465_s28 = smov %s1131_s29 }
 0x41c   : > { %s1466_s29 = smov %s1250_s18  ;;  %22 = sbr.rel (!%p20_p6) target bundleno = 6 (0x6), region = 107 }
 0x423   :  { %754 = vsyncpa [#allocation5], 1 }
 0x424   :  { %756 = vsyncpa [#allocation5 + $0x1], 1 }
 0x425   :  { %757 = vsyncpa [#allocation8], 1 }
 0x426   :  { %758 = vsyncpa [#allocation6], 1 }
 0x427   :  { %760 = vsyncpa [#allocation6 + $0x1], 1 }

</bundles_post_ra>
